<compile_context>
chip_gen: v7x
topology: tpu7x:2x2x1
jax: 0.10.0
libtpu: 0.0.40
codegen_flags: <defaults>
</compile_context>

<pallas_src>
import jax
import jax.numpy as jnp
from jax.experimental import pallas as pl
from jax.experimental.pallas import tpu as pltpu


def _postproc_kernel(a_ref, b_ref, x_ref, conc_ref):
    # a_ref / b_ref: SMEM scalars (shape (1,)); x_ref / conc_ref: VMEM (tb, N).
    # Single fused multiply-add per vreg: conc = x * a + b.
    conc_ref[...] = x_ref[...] * a_ref[0] + b_ref[0]


def _choose_tb(B, N, target_bytes):
    """Batch-tile size: ~target_bytes per buffer, multiple of 8 sublanes."""
    row_bytes = max(1, N * 4)
    tb = max(8, (target_bytes // row_bytes) // 8 * 8)
    if tb >= B:
        # Whole array fits in one block; still split along B into 2 tiles when
        # cleanly possible so both TensorCores on v7x get work.
        if B >= 16 and (B // 2) % 8 == 0:
            return B // 2
        return B
    return tb


def post_processing(normalized_concentration, training_mad, training_median,
                    *, target_block_bytes=2 << 20):
    """Pallas equivalent of PostProcessing.forward.

    normalized_concentration: (B, N, 1) float32
    returns (concentration (B, N), normalized_concentration (B, N))
    """
    # Glue: squeeze(-1) outside the kernel.  The squeezed array is also the
    # second return value, so this (potential) relayout is unavoidable unless
    # the producer emits (B, N) directly.
    # TODO(synk): have the upstream producer emit (B, N) to skip this relayout.
    x = jnp.squeeze(normalized_concentration, axis=-1)
    B, N = x.shape

    tb = _choose_tb(B, N, target_block_bytes)

    # Fold the affine transform host-side: conc = x * a + b.
    scale = 2.5758 * 1.4826 * float(training_mad)
    a = jnp.asarray([2.0 * scale], dtype=jnp.float32)
    b = jnp.asarray([float(training_median) - scale], dtype=jnp.float32)

    grid = (pl.cdiv(B, tb),)
    vmem_spec = pl.BlockSpec((tb, N), lambda i: (i, 0))
    smem_spec = pl.BlockSpec(memory_space=pltpu.MemorySpace.SMEM)

    conc = pl.pallas_call(
        _postproc_kernel,
        grid=grid,
        in_specs=[smem_spec, smem_spec, vmem_spec],
        out_specs=vmem_spec,
        out_shape=jax.ShapeDtypeStruct((B, N), jnp.float32),
        compiler_params=pltpu.CompilerParams(
            dimension_semantics=("parallel",)),
    )(a, b, x)

    # Passthrough output comes straight from the wrapper — no kernel copy.
    return conc, x


if __name__ == "__main__":
    key = jax.random.PRNGKey(0)
    B, N = 16, 256
    x = jax.random.uniform(key, (B, N, 1), dtype=jnp.float32)

    # Deterministic "parameters" (non-trainable buffers in the torch module).
    training_mad = 0.37
    training_median = 1.25

    conc, norm = post_processing(x, training_mad, training_median)
    jax.block_until_ready((conc, norm))

    # Reference check (pure JAX).
    x_sq = jnp.squeeze(x, axis=-1)
    ref_conc = (2.0 * x_sq - 1.0) * (2.5758 * 1.4826 * training_mad) + training_median
    assert jnp.allclose(conc, ref_conc, atol=1e-5), "concentration mismatch"
    assert jnp.allclose(norm, x_sq), "normalized passthrough mismatch"

    print("KERNEL_OK")
</pallas_src>

<mosaic_0001>
module attributes {stable_mosaic.version = 11 : i64} {
  func.func @_postproc_kernel(%arg0: i32, %arg1: memref<1xf32, #tpu.memory_space<smem>>, %arg2: memref<1xf32, #tpu.memory_space<smem>>, %arg3: memref<8x256xf32, #tpu.memory_space<vmem>>, %arg4: memref<8x256xf32, #tpu.memory_space<vmem>>) attributes {dimension_semantics = [#tpu.dimension_semantics<parallel>], iteration_bounds = array<i64: 2>, scalar_prefetch = 0 : i64, scratch_operands = 0 : i64, tpu.core_type = #tpu.core_type<tc>, window_params = [{transform_indices = @transform_0, window_bounds = array<i64: 1>}, {transform_indices = @transform_1, window_bounds = array<i64: 1>}, {transform_indices = @transform_2, window_bounds = array<i64: 8, 256>}, {transform_indices = @transform_3, window_bounds = array<i64: 8, 256>}]} {
    %c0 = arith.constant 0 : index
    %c0_0 = arith.constant 0 : index
    %0 = vector.load %arg3[%c0, %c0_0] : memref<8x256xf32, #tpu.memory_space<vmem>>, vector<8x256xf32>
    %c0_1 = arith.constant 0 : index
    %1 = memref.load %arg1[%c0_1] : memref<1xf32, #tpu.memory_space<smem>>
    %2 = vector.broadcast %1 : f32 to vector<8x256xf32>
    %3 = arith.mulf %0, %2 : vector<8x256xf32>
    %c0_2 = arith.constant 0 : index
    %4 = memref.load %arg2[%c0_2] : memref<1xf32, #tpu.memory_space<smem>>
    %5 = vector.broadcast %4 : f32 to vector<8x256xf32>
    %6 = arith.addf %3, %5 : vector<8x256xf32>
    %c0_3 = arith.constant 0 : index
    %c0_4 = arith.constant 0 : index
    %7 = vector.load %arg4[%c0_3, %c0_4] : memref<8x256xf32, #tpu.memory_space<vmem>>, vector<8x256xf32>
    tpu.vector_store %arg4[%c0_3, %c0_4], %6 {strides = array<i32>} : memref<8x256xf32, #tpu.memory_space<vmem>>, vector<8x256xf32>,
    return
  }
  func.func @transform_0(%arg0: i32) -> i32 {
    %c0_i32 = arith.constant 0 : i32
    %c0_i32_0 = arith.constant 0 : i32
    return %c0_i32 : i32
  }
  func.func @transform_1(%arg0: i32) -> i32 {
    %c0_i32 = arith.constant 0 : i32
    %c0_i32_0 = arith.constant 0 : i32
    return %c0_i32 : i32
  }
  func.func @transform_2(%arg0: i32) -> (i32, i32) {
    %c0_i32 = arith.constant 0 : i32
    %c0_i32_0 = arith.constant 0 : i32
    return %arg0, %c0_i32 : i32, i32
  }
  func.func @transform_3(%arg0: i32) -> (i32, i32) {
    %c0_i32 = arith.constant 0 : i32
    %c0_i32_0 = arith.constant 0 : i32
    return %arg0, %c0_i32 : i32, i32
  }
}

</mosaic_0001>

<bundles_post_ra>
// kernel: tpu_custom_call.1
= control target key start
LH: loop header
LB: loop body
LE: loop exit
PB: predicated region body
PF: predicated region fallthrough
CT: control target
= control target key end

     0   :  { %s635_s0 = inlined_call_operand.<no memory space> [shape: f32[1], index: 0, kind: input, shape index: {}]   ;;  %s636_s1 = inlined_call_operand.<no memory space> [shape: f32[1], index: 1, kind: input, shape index: {}]   ;;  %s637_s2 = inlined_call_operand.hbm [shape: f32[16,256], index: 2, kind: input, shape index: {}]   ;;  %s638_s3 = inlined_call_operand.hbm [shape: f32[16,256], index: 3, kind: output, shape index: {}]  }
   0x1   :  { %8 = sst [smem:[#allocation2]] %s635_s0 }
   0x2   :  { %9 = sst [smem:[#allocation3]] %s636_s1 }
   0x3   :  { %10 = vsyncpa [#allocation5], 0 }
   0x4   :  { %12 = vsyncpa [#allocation5 + $0x1], 0 }
   0x5   :  { %13 = vsyncpa [#allocation6], 0 }
   0x6   :  { %15 = vsyncpa [#allocation6 + $0x1], 0  ;;  %s474_s16 = smov 0   ;;  %s476_s17 = smov 0  }
   0x7   :  { %s478_s18 = smov 0   ;;  %s480_s19 = smov 0  }
   0x8 LB: > { %s495_s0 = sadd.s32 4294967295, %s444_s19   ;;  %s286_s1 = sadd.s32 4294967294, %s444_s19   ;;  %s444_s19 = sphi %s480_s19, %s653_s19   ;;  %s440_s18 = sphi %s478_s18, %s652_s18   ;;  %s436_s17 = sphi %s476_s17, %s651_s17   ;;  %s432_s16 = sphi %s474_s16, %s650_s16  }
   0x9   : > { %s499_s20 = sadd.s32 1, %s444_s19   ;;  %s70_s21 = sadd.s32 1, %s440_s18 }
   0xa   : > { %s67_s22 = ssub.s32 %s444_s19, %s499_s20  ;;  %p77_p0 = scmp.ne.s32.totalorder %s440_s18, %s436_s17 }
   0xb   : > { %p68_p1 = scmp.eq.s32.totalorder %s67_s22, 0  ;;  %p78_p2 = scmp.eq.s32.totalorder %s444_s19, 0 }
   0xc   : > { %p83_p3 = scmp.ne.s32.totalorder %s436_s17, %s432_s16  ;;  %p84_p4 = scmp.eq.s32.totalorder %s495_s0, 0 }
   0xd   : > { %s511_s23 = scalar_select %p68_p1, %s440_s18, %s70_s21  }
   0xe   : > { %p513_p5 = por %p78_p2, %p77_p0  ;;  %p517_p6 = por %p84_p4, %p83_p3 }
   0xf   : > { %p107_p7 = scmp.eq.s32.totalorder %s495_s0, 1  ;;  %p113_p8 = scmp.eq.s32.totalorder %s286_s1, 1 }
  0x10   : > { %p314_p10 = scmp.lt.s32.totalorder %s444_s19, 2  ;;  %s139_s28 = sand.u32 1, %s440_s18  }
  0x11   : > { %p524_p11 = por %p107_p7, %p77_p0  ;;  %p528_p12 = por %p113_p8, %p83_p3 }
  0x12   : > { %s300_s29 = sshll.u32 %s444_s19, 8  ;;  %s289_s30 = sshll.u32 %s139_s28, 4 }
  0x13   : > { %s642_s26 = scalar_select %p524_p11, 1, 0 }
  0x14   : > { %s643_s27 = scalar_select %p528_p12, 1, 0 }
  0x15   : > { %s537_s6 = scalar_lea.hbm %s637_s2, %s300_s29  ;;  %s143_s7 = scalar_lea.vmem [#allocation4], %s289_s30 }
  0x16   : > { %s151_s8 = sshll.u32 %s143_s7, 4  ;;  %p541_p13 = pnand %p314_p10, %p513_p5  ;;  %s545_s8 = int_to_ptr.vmem [resolvable:$true] %s151_s8 }
  0x17   : > { %s140_s10 = scalar_lea.sflag [#allocation5], %s139_s28  ;;  %s348_s11 = scalar_lea.hbm %s537_s6, 256 }
  0x18   : > { %p349_p2 = scmp.ne.s32.totalorder %s537_s6, %s348_s11  ;;  %p350_p3 = pneg %p541_p13 }
  0x19   : > { %s353_s14 = scalar_lea.hbm %s637_s2, 512  ;;  %p354_p5 = scmp.lt.u32.totalorder %s537_s6, %s637_s2 }
  0x1a   : > { %p351_p4 = pnand %p350_p3, %p349_p2  ;;  %p355_p8 = scmp.lt.u32.totalorder %s353_s14, %s348_s11 }
  0x1b   : > { %p357_p9 = scmp.lt.u32.totalorder %s348_s11, %s537_s6 }
  0x1c   : > { %p352_p7 = pneg %p351_p4  ;;  %p356_p10 = por %p355_p8, %p354_p5 }
  0x1e   : > { %p358_p0 = por %p357_p9, %p356_p10 }
  0x20   : > { %p359_p1 = pnand %p358_p0, %p352_p7 }
  0x22   : > { %362 = shalt.err (!%p359_p1)
}
  0x23   : > { %s363_s21 = scalar_lea.vmem %s545_s8, 256  ;;  %s446_s22 = smov [#allocation4]  }
  0x24   : > { %p364_p2 = scmp.ne.s32.totalorder %s545_s8, %s363_s21  ;;  %s368_s24 = sshll.u32 %s446_s22, 4  ;;  %s369_s24 = int_to_ptr.vmem [resolvable:$false] %s368_s24 }
  0x25   : > { %s370_s28 = scalar_lea.vmem %s369_s24, 512  ;;  %p371_p11 = scmp.lt.s32.totalorder %s545_s8, %s369_s24 }
  0x26   : > { %p366_p4 = pnand %p364_p2, %p350_p3  ;;  %p372_p5 = scmp.lt.s32.totalorder %s370_s28, %s363_s21 }
  0x28   : > { %p367_p12 = pneg %p366_p4  ;;  %p373_p8 = por %p372_p5, %p371_p11 }
  0x2a   : > { %p374_p9 = pnand %p373_p8, %p367_p12 }
  0x2c   : > { %377 = shalt.err (!%p374_p9)
}
  0x2d   : > { %309 = dma.hbm_to_vmem [thread:$0]  (!%p541_p13), %s537_s6, 256, %s545_s8, %s140_s10  }
  0x2e   : > { %p645_p0 = scmp.lt.s32.totalorder %s444_s19, 3  ;;  %p646_p1 = scmp.ge.s32.totalorder %s444_s19, 1 }
  0x30   : > { %p157_p3 = pnand %p646_p1, %p645_p0 }
  0x31   : > { %s579_s29 = sand.u32 (!%p157_p3), 1, %s436_s17  }
  0x32   : > { %160 = sbr.rel (%p157_p3) target bundleno = 85 (0x55), region = 32  ;;  %s293_s30 = sshll.u32 (!%p157_p3), %s579_s29, 4 }
  0x33   : > { %s163_s4 = scalar_lea.sflag (!%p157_p3), [#allocation5], %s579_s29  ;;  %s166_s5 = scalar_lea.vmem (!%p157_p3), [#allocation4], %s293_s30 }
  0x39   : > { %423 = dma.done.wait (%p517_p6), %s163_s4, 256  }
  0x3a   : > { %425 = vsyncadd (%p517_p6), %s163_s4, 4294967040  ;;  %s191_s6 = sld [smem:[#allocation2]]  ;;  %v189_v0 = vld [vmem:[%s166_s5] sm:$0xff]  ;;  %s188_s8 = scalar_lea.vmem [#allocation7], %s293_s30  ;;  %v190_v3 = vld [vmem:[%s166_s5 + $0x8] sm:$0xff] }
  0x3b   : > { %s195_s7 = sld [smem:[#allocation3]]  ;;  %s216_s9 = sshll.u32 %s188_s8, 4  ;;  %s588_s9 = int_to_ptr.vmem [resolvable:$true] %s216_s9 }
  0x3c   : > { %s301_s10 = sshll.u32 %s495_s0, 8  ;;  %s202_s13 = scalar_lea.sflag [#allocation6], %s579_s29 }
  0x3d   : > { %s593_s12 = scalar_lea.hbm %s638_s3, %s301_s10  ;;  %s378_s14 = scalar_lea.vmem %s588_s9, 256 }
  0x3e   : > { %p379_p6 = scmp.ne.s32.totalorder %s588_s9, %s378_s14  ;;  %p647_p11 = scmp.ne.s32.totalorder %s642_s26, 0 }
  0x3f   : > { %s447_s0 = smov [#allocation7]  }
  0x40   : > { %v192_v1 = vstv %s191_s6  ;;  %p380_p12 = pnand %p379_p6, %p647_p11  ;;  %s382_s15 = sshll.u32 %s447_s0, 4  ;;  %s383_s15 = int_to_ptr.vmem [resolvable:$false] %s382_s15 }
  0x41   : > { %v196_v2 = vstv %s195_s7  ;;  %v193_v4 = vmul.f32 %v192_v1, %v189_v0  ;;  %v194_v5 = vmul.f32 %v192_v1, %v190_v3  ;;  %s384_s1 = scalar_lea.vmem %s383_s15, 512  ;;  %p385_p7 = scmp.lt.s32.totalorder %s588_s9, %s383_s15 }
  0x42   : > { %p381_p13 = pneg %p380_p12  ;;  %p386_p10 = scmp.lt.s32.totalorder %s384_s1, %s378_s14 }
  0x43   : > { %v197_v6 = vadd.f32 %v196_v2, %v193_v4  ;;  %v198_v7 = vadd.f32 %v196_v2, %v194_v5 }
  0x44   : > { %p387_p2 = por %p386_p10, %p385_p7 }
  0x45   : > { %199 = vst [vmem:[%s188_s8] sm:$0xff] %v197_v6  ;;  %200 = vst [vmem:[%s188_s8 + $0x8] sm:$0xff] %v198_v7 }
  0x46   : > { %p388_p4 = pnand %p387_p2, %p381_p13 }
  0x48   : > { %391 = shalt.err (!%p388_p4)
}
  0x49   : > { %s392_s21 = scalar_lea.hbm %s593_s12, 256  ;;  %s396_s28 = scalar_lea.hbm %s638_s3, 512 }
  0x4a   : > { %p393_p5 = scmp.ne.s32.totalorder %s593_s12, %s392_s21  ;;  %p397_p0 = scmp.lt.u32.totalorder %s593_s12, %s638_s3 }
  0x4b   : > { %p398_p1 = scmp.lt.u32.totalorder %s396_s28, %s392_s21  ;;  %p400_p6 = scmp.lt.u32.totalorder %s392_s21, %s593_s12 }
  0x4c   : > { %p394_p8 = pnand %p393_p5, %p647_p11 }
  0x4d   : > { %p399_p3 = por %p398_p1, %p397_p0 }
  0x4e   : > { %p395_p9 = pneg %p394_p8 }
  0x4f   : > { %p401_p12 = por %p400_p6, %p399_p3 }
  0x51   : > { %p402_p13 = pnand %p401_p12, %p395_p9 }
  0x53   : > { %405 = shalt.err (!%p402_p13)
}
  0x54   : > { %304 = dma.vmem_to_hbm [thread:$0]  (%p647_p11), %s588_s9, 256, %s593_s12, %s202_s13  }
  0x55 PF: > { %s228_s4 = sand.u32 1, %s432_s16   ;;  %p648_p7 = scmp.ne.s32.totalorder %s643_s27, 0 }
  0x56   : > { %p649_p10 = scmp.ge.s32.totalorder %s444_s19, 2  ;;  %s229_s5 = scalar_lea.sflag [#allocation6], %s228_s4 }
  0x58   : > { %p311_p2 = pnand %p649_p10, %p648_p7 }
  0x5a   : > { %427 = dma.done.wait (!%p311_p2), %s229_s5, 256  }
  0x5b   : > { %429 = vsyncadd (!%p311_p2), %s229_s5, 4294967040  ;;  %p18_p4 = scmp.ge.s32.totalorder %s499_s20, 4   ;;  %s650_s16 = smov %s436_s17 }
  0x5c   : > { %s651_s17 = smov %s440_s18  ;;  %s652_s18 = smov %s511_s23 }
  0x5d   : > { %s653_s19 = smov %s499_s20  ;;  %20 = sbr.rel (!%p18_p4) target bundleno = 8 (0x8), region = 77 }
  0x64   :  { %234 = vsyncpa [#allocation5], 1 }
  0x65   :  { %236 = vsyncpa [#allocation5 + $0x1], 1 }
  0x66   :  { %237 = vsyncpa [#allocation6], 1 }
  0x67   :  { %239 = vsyncpa [#allocation6 + $0x1], 1 }

</bundles_post_ra>
